<compile_context>
chip_gen: v7x
topology: tpu7x:2x2x1
jax: 0.10.0
libtpu: 0.0.40
codegen_flags: <defaults>
</compile_context>

<pallas_src>
import functools

import jax
import jax.numpy as jnp
from jax.experimental import pallas as pl
from jax.experimental.pallas import tpu as pltpu


def _label_smoothing_kernel(x_ref, t_ref, o_ref, *, confidence, smoothing,
                            n_rows, tile_rows, n_classes):
    i = pl.program_id(0)

    x = x_ref[...]                                   # (TM, C) native dtype
    t = t_ref[...]                                   # (TM, 1) int32

    # row max in native dtype (bf16 VALU on v6e/v7x).
    m = jnp.max(x, axis=-1, keepdims=True)           # (TM, 1)

    # exp / logsumexp: only this path is cast to f32 (EUP + f32 accumulate).
    shifted_f32 = (x - m).astype(jnp.float32)        # fused sub + cast input to exp
    lse = jnp.log(jnp.sum(jnp.exp(shifted_f32), axis=-1, keepdims=True))  # (TM,1) f32

    # gather x[target] as compare + select + reduce; (1, C) iota broadcast.
    col = jax.lax.broadcasted_iota(jnp.int32, (1, n_classes), 1)          # (1, C)
    picked = jnp.sum(jnp.where(col == t, x, jnp.zeros((), x.dtype)),
                     axis=-1, keepdims=True, dtype=jnp.float32)           # (TM, 1)

    # mean over classes from raw x, accumulated in f32.
    mean_x = jnp.sum(x, axis=-1, keepdims=True,
                     dtype=jnp.float32) * (1.0 / n_classes)               # (TM, 1)

    # confidence + smoothing == 1  =>  the -max terms cancel:
    #   loss_row = (m + lse) - confidence * x[t] - smoothing * mean(x)
    loss_rows = (m.astype(jnp.float32) + lse
                 - confidence * picked - smoothing * mean_x)              # (TM, 1) f32

    # store tile_sum / 1024 into every element of the (8,128) block so the
    # wrapper can do one contiguous jnp.sum over all partials.
    scale = 1.0 / (8.0 * 128.0)

    if n_rows % tile_rows != 0:
        last = pl.num_programs(0) - 1

        @pl.when(i == last)
        def _():
            row = (jax.lax.broadcasted_iota(jnp.int32, loss_rows.shape, 0)
                   + i * tile_rows)
            masked = jnp.where(row < n_rows, loss_rows, 0.0)
            o_ref[...] = jnp.full(o_ref.shape, jnp.sum(masked) * scale,
                                  dtype=jnp.float32)

        @pl.when(i != last)
        def _():
            o_ref[...] = jnp.full(o_ref.shape, jnp.sum(loss_rows) * scale,
                                  dtype=jnp.float32)
    else:
        o_ref[...] = jnp.full(o_ref.shape, jnp.sum(loss_rows) * scale,
                              dtype=jnp.float32)


def _pick_tile_rows(n, c, itemsize):
    # Size the logits tile by bytes (~3 MiB): 1-2 MiB already reaches ~85% of
    # HBM roofline, and with double-buffering + f32 temporaries this keeps the
    # pipeline well inside v7x's 64 MiB/TC VMEM (and v5e's scoped default).
    budget_bytes = 3 * 1024 * 1024
    row_align = 16 if itemsize < 4 else 8            # bf16 packs 2 rows/sublane
    tm = budget_bytes // max(1, c * itemsize)
    tm = max(row_align, (tm // row_align) * row_align)
    if n <= tm:
        return n                                     # single full block (always legal)
    return tm


def label_smoothing_loss(x, target, smoothing=0.1):
    """x: (N, C) float logits (f32 or bf16); target: (N,) int labels -> scalar f32."""
    confidence = 1.0 - smoothing
    n, c = x.shape
    target2d = target.reshape(n, 1).astype(jnp.int32)

    tm = _pick_tile_rows(n, c, x.dtype.itemsize)
    num_tiles = pl.cdiv(n, tm)

    kernel = functools.partial(
        _label_smoothing_kernel,
        confidence=confidence, smoothing=smoothing,
        n_rows=n, tile_rows=tm, n_classes=c)

    partials = pl.pallas_call(
        kernel,
        out_shape=jax.ShapeDtypeStruct((num_tiles, 8, 128), jnp.float32),
        grid=(num_tiles,),
        in_specs=[
            # If profiling shows exposed DMA with the smaller tiles, add
            # pipeline_mode=pl.Buffered(3) here (negligible VMEM at 2-4 MiB).
            pl.BlockSpec((tm, c), lambda i: (i, 0)),   # logits row tile
            pl.BlockSpec((tm, 1), lambda i: (i, 0)),   # targets row tile
        ],
        out_specs=pl.BlockSpec((1, 8, 128), lambda i: (i, 0, 0)),
        compiler_params=pltpu.CompilerParams(
            dimension_semantics=("parallel",),         # no cross-tile dependence
            vmem_limit_bytes=32 * 1024 * 1024,         # fits v5e/v6e/v7x scoped VMEM
        ),
    )(x, target2d)

    # Each block sums to its tile's loss sum (pre-scaled by 1/1024 in-kernel),
    # so a single contiguous reduce + one divide by N gives the mean.
    return jnp.sum(partials) / n


if __name__ == "__main__":
    key = jax.random.PRNGKey(0)
    kx, kt = jax.random.split(key)

    N, C = 8, 32
    x = jax.random.normal(kx, (N, C), dtype=jnp.float32)
    target = jax.random.randint(kt, (N,), 0, C, dtype=jnp.int32)
    smoothing = 0.1

    loss = jax.block_until_ready(label_smoothing_loss(x, target, smoothing))

    # pure-JAX reference check
    logprobs = jax.nn.log_softmax(x, axis=-1)
    nll = -jnp.take_along_axis(logprobs, target[:, None], axis=-1)[:, 0]
    smooth = -jnp.mean(logprobs, axis=-1)
    ref = jnp.mean((1.0 - smoothing) * nll + smoothing * smooth)

    assert jnp.allclose(loss, ref, rtol=1e-5, atol=1e-5), (loss, ref)
    print("KERNEL_OK")
</pallas_src>

<mosaic_0001>
module attributes {stable_mosaic.version = 11 : i64} {
  func.func @_label_smoothing_kernel(%arg0: i32, %arg1: memref<8x32xf32, #tpu.memory_space<vmem>>, %arg2: memref<8x1xi32, #tpu.memory_space<vmem>>, %arg3: memref<1x8x128xf32, #tpu.memory_space<vmem>>) attributes {dimension_semantics = [#tpu.dimension_semantics<parallel>], iteration_bounds = array<i64: 1>, scalar_prefetch = 0 : i64, scratch_operands = 0 : i64, tpu.core_type = #tpu.core_type<tc>, window_params = [{transform_indices = @transform_0, window_bounds = array<i64: 8, 32>}, {transform_indices = @transform_1, window_bounds = array<i64: 8, 1>}, {transform_indices = @transform_2, window_bounds = array<i64: 1, 8, 128>}]} {
    %c0 = arith.constant 0 : index
    %c0_0 = arith.constant 0 : index
    %0 = vector.load %arg1[%c0, %c0_0] : memref<8x32xf32, #tpu.memory_space<vmem>>, vector<8x32xf32>
    %c0_1 = arith.constant 0 : index
    %c0_2 = arith.constant 0 : index
    %1 = vector.load %arg2[%c0_1, %c0_2] : memref<8x1xi32, #tpu.memory_space<vmem>>, vector<8x1xi32>
    %cst = arith.constant dense<0xFF800000> : vector<8xf32>
    %2 = vector.multi_reduction <maximumf>, %0, %cst [1] : vector<8x32xf32> to vector<8xf32>
    %3 = vector.shape_cast %2 : vector<8xf32> to vector<8x1xf32>
    %4 = vector.broadcast %3 : vector<8x1xf32> to vector<8x32xf32>
    %5 = arith.subf %0, %4 : vector<8x32xf32>
    %6 = math.exp %5 : vector<8x32xf32>
    %cst_3 = arith.constant dense<0.000000e+00> : vector<8xf32>
    %7 = vector.multi_reduction <add>, %6, %cst_3 [1] : vector<8x32xf32> to vector<8xf32>
    %8 = vector.shape_cast %7 : vector<8xf32> to vector<8x1xf32>
    %9 = math.log %8 : vector<8x1xf32>
    %10 = tpu.iota {dimensions = array<i32: 1>} : vector<1x32xi32>
    %11 = vector.broadcast %10 : vector<1x32xi32> to vector<8x32xi32>
    %12 = vector.broadcast %1 : vector<8x1xi32> to vector<8x32xi32>
    %13 = arith.cmpi eq, %11, %12 : vector<8x32xi32>
    %cst_4 = arith.constant 0.000000e+00 : f32
    %14 = vector.broadcast %cst_4 : f32 to vector<8x32xf32>
    %15 = arith.select %13, %0, %14 : vector<8x32xi1>, vector<8x32xf32>
    %cst_5 = arith.constant dense<0.000000e+00> : vector<8xf32>
    %16 = vector.multi_reduction <add>, %15, %cst_5 [1] : vector<8x32xf32> to vector<8xf32>
    %17 = vector.shape_cast %16 : vector<8xf32> to vector<8x1xf32>
    %cst_6 = arith.constant dense<0.000000e+00> : vector<8xf32>
    %18 = vector.multi_reduction <add>, %0, %cst_6 [1] : vector<8x32xf32> to vector<8xf32>
    %19 = vector.shape_cast %18 : vector<8xf32> to vector<8x1xf32>
    %cst_7 = arith.constant 3.125000e-02 : f32
    %20 = vector.broadcast %cst_7 : f32 to vector<8x1xf32>
    %21 = arith.mulf %19, %20 : vector<8x1xf32>
    %22 = arith.addf %3, %9 : vector<8x1xf32>
    %cst_8 = arith.constant 0.899999976 : f32
    %23 = vector.broadcast %cst_8 : f32 to vector<8x1xf32>
    %24 = arith.mulf %23, %17 : vector<8x1xf32>
    %25 = arith.subf %22, %24 : vector<8x1xf32>
    %cst_9 = arith.constant 1.000000e-01 : f32
    %26 = vector.broadcast %cst_9 : f32 to vector<8x1xf32>
    %27 = arith.mulf %26, %21 : vector<8x1xf32>
    %28 = arith.subf %25, %27 : vector<8x1xf32>
    %29 = vector.shape_cast %28 : vector<8x1xf32> to vector<1x8x1xf32>
    %cst_10 = arith.constant dense<0.000000e+00> : vector<1xf32>
    %30 = vector.multi_reduction <add>, %29, %cst_10 [1, 2] : vector<1x8x1xf32> to vector<1xf32>
    %31 = vector.shape_cast %30 : vector<1xf32> to vector<1x1x1xf32>
    %32 = vector.extract %31[0, 0, 0] : f32 from vector<1x1x1xf32>
    %cst_11 = arith.constant 9.765625E-4 : f32
    %33 = arith.mulf %32, %cst_11 : f32
    %34 = vector.broadcast %33 : f32 to vector<1x8x128xf32>
    %c0_12 = arith.constant 0 : index
    %c0_13 = arith.constant 0 : index
    %c0_14 = arith.constant 0 : index
    %35 = vector.load %arg3[%c0_12, %c0_13, %c0_14] : memref<1x8x128xf32, #tpu.memory_space<vmem>>, vector<1x8x128xf32>
    tpu.vector_store %arg3[%c0_12, %c0_13, %c0_14], %34 {strides = array<i32>} : memref<1x8x128xf32, #tpu.memory_space<vmem>>, vector<1x8x128xf32>,
    return
  }
  func.func @transform_0(%arg0: i32) -> (i32, i32) {
    %c0_i32 = arith.constant 0 : i32
    %c0_i32_0 = arith.constant 0 : i32
    return %arg0, %c0_i32 : i32, i32
  }
  func.func @transform_1(%arg0: i32) -> (i32, i32) {
    %c0_i32 = arith.constant 0 : i32
    %c0_i32_0 = arith.constant 0 : i32
    return %arg0, %c0_i32 : i32, i32
  }
  func.func @transform_2(%arg0: i32) -> (i32, i32, i32) {
    %c0_i32 = arith.constant 0 : i32
    %c0_i32_0 = arith.constant 0 : i32
    %c0_i32_1 = arith.constant 0 : i32
    return %arg0, %c0_i32, %c0_i32_0 : i32, i32, i32
  }
}

</mosaic_0001>

<bundles_post_ra>
// kernel: tpu_custom_call.1
= control target key start
LH: loop header
LB: loop body
LE: loop exit
PB: predicated region body
PF: predicated region fallthrough
CT: control target
= control target key end

     0   :  { %vm14_vm0 = vcmask 261120   ;;  %s145_s0 = inlined_call_operand.vmem [shape: f32[8,32], index: 0, kind: input, shape index: {}]   ;;  %s146_s1 = inlined_call_operand.vmem [shape: s32[8,1], index: 1, kind: input, shape index: {}]   ;;  %s147_s2 = inlined_call_operand.hbm [shape: f32[1,8,128], index: 2, kind: output, shape index: {}]  }
   0x1   :  { %v12_v0 = vld [vmem:[%s145_s0] sm:$0xff] }
   0x2   :  { %7 = vsyncpa [#allocation3], 0  ;;  %v15_v1 = vsel %vm14_vm0, %v12_v0, -inf  ;;  %v106_v2 = vmov 0   ;;  %v13_v3 = vld [vmem:[%s146_s1] sm:$0xff]  ;;  %v26_v7 = vlaneseq  ;;  %v36_v14 = vsel %vm14_vm0, %v12_v0, 0.0 }
   0x3   :  { %77 = vset.pattern.permute.xlu0 %v106_v2  ;;  %vm45_vm2 = vcmask 7168   ;;  %s107_s0 = smov [#allocation2]  }
   0x4   :  { %16 = vmax.xlane.f32.xlu0 %v15_v1  ;;  %v27_v8 = vand.u32 127, %v26_v7  ;;  %s65_s1 = sshll.u32 %s107_s0, 4  ;;  %s66_s1 = int_to_ptr.vmem [resolvable:$true] %s65_s1 }
   0x5   :  { %s82_s15 = scalar_lea.vmem %s66_s1, 128  ;;  %p87_p1 = scmp.lt.s32.totalorder %s66_s1, %s66_s1 }
   0x6   :  { %p83_p0 = scmp.ne.s32.totalorder %s66_s1, %s82_s15  ;;  %p88_p2 = scmp.lt.s32.totalorder %s82_s15, %s82_s15 }
   0x8   :  { %p89_p3 = por %p88_p2, %p87_p1 }
   0xa   :  { %p90_p4 = pnand %p89_p3, %p83_p0 }
  0x1a   :  { %29 = vperm.xlu0 %77, %v13_v3  }
  0x91   :  { %v17_v4 = vpop.xlane.xlu0 %16 }
  0x92   :  { %v18_v5 = vsub.f32 %v12_v0, %v17_v4 }
  0x94   :  { %v19_v6 = vmul.f32 1.442695, %v18_v5 }
  0x96   :  { %78 = vpow2.f32 %v19_v6 }
  0x99   :  { %v30_v9 = vpop.permute.xlu0 %29 }
  0x9a   :  { %vm31_vm1 = vcmp.eq.s32.totalorder %v27_v8, %v30_v9 }
  0x9b   :  { %v32_v11 = vsel %vm31_vm1, %v12_v0, 0.0 }
  0x9c   :  { %v33_v13 = vsel %vm14_vm0, %v32_v11, 0.0 }
  0xa0   :  { %v79_v10 = vpop.eup %78 }
  0xa1   :  { %v21_v12 = vsel %vm14_vm0, %v79_v10, 0.0 }
  0xa2   :  { %22 = vadd.xlane.f32.xlu1 %v21_v12 }
  0xa6   :  { %34 = vadd.xlane.f32.xlu1 %v33_v13 }
  0xaa   :  { %37 = vadd.xlane.f32.xlu1 %v36_v14 }
 0x12f   :  { %v23_v15 = vpop.xlane.xlu1 %22 }
 0x130   :  { %80 = vlog2.f32 %v23_v15 }
 0x133   :  { %v35_v16 = vpop.xlane.xlu1 %34 }
 0x134   :  { %v41_v22 = vmul.f32 0.9, %v35_v16 }
 0x137   :  { %v38_v17 = vpop.xlane.xlu1 %37 }
 0x138   :  { %v39_v18 = vmul.f32 0.03125, %v38_v17 }
 0x13a   :  { %v81_v19 = vpop.eup %80  ;;  %v43_v23 = vmul.f32 0.1, %v39_v18 }
 0x13b   :  { %v25_v20 = vmul.f32 0.6931472, %v81_v19 }
 0x13d   :  { %v40_v21 = vadd.f32 %v25_v20, %v17_v4 }
 0x13f   :  { %v42_v24 = vsub.f32 %v40_v21, %v41_v22 }
 0x141   :  { %v44_v25 = vsub.f32 %v42_v24, %v43_v23 }
 0x143   :  { %v46_v26 = vsel %vm45_vm2, %v44_v25, 0.0 }
 0x144   :  { %47 = vadd.xlane.f32.xlu1 %v46_v26 }
 0x1d1   :  { %v48_v27 = vpop.xlane.xlu1 %47 }
 0x1d2   :  { %v49_v28 = vrot.slane %v48_v27, 4 }
 0x1d4   :  { %v50_v29 = vadd.f32 %v49_v28, %v48_v27 }
 0x1d6   :  { %v51_v30 = vrot.slane %v50_v29, 2 }
 0x1d8   :  { %v52_v31 = vadd.f32 %v51_v30, %v50_v29 }
 0x1da   :  { %v53_v32 = vrot.slane %v52_v31, 1 }
 0x1dc   :  { %v54_v33 = vadd.f32 %v53_v32, %v52_v31 }
 0x1de   :  { %73 = vpush %v54_v33 }
 0x20f   :  { %s74_s13 = spop %73 }
 0x210   :  { %s56_s14 = smul.f32 0.0009765625, %s74_s13 }
 0x212   :  { %v57_v34 = vstv %s56_s14 }
 0x213   :  { %58 = vst [vmem:[#allocation2] sm:$0xff] %v57_v34 }
 0x214   :  { %93 = shalt.err (!%p90_p4)
}
 0x215   :  { %s94_s18 = scalar_lea.hbm %s147_s2, 128 }
 0x216   :  { %p95_p5 = scmp.ne.s32.totalorder %s147_s2, %s94_s18  ;;  %p98_p6 = scmp.lt.u32.totalorder %s94_s18, %s147_s2 }
 0x218   :  { %p100_p7 = pnand %p98_p6, %p95_p5 }
 0x21a   :  { %103 = shalt.err (!%p100_p7)
}
 0x21b   :  { %68 = dma.vmem_to_hbm [thread:$0]  %s66_s1, 128, %s147_s2, [#allocation3]  }
 0x21c   :  { %104 = dma.done.wait [#allocation3], 128  }
 0x21d   :  { %105 = vsyncadd [#allocation3], 4294967168 }
 0x21e   :  { %72 = vsyncpa [#allocation3], 1 }

</bundles_post_ra>
